<compile_context>
chip_gen: v5e
topology: v5e:2x2
jax: 0.10.0
libtpu: 0.0.40
codegen_flags: <defaults>
</compile_context>

<pallas_src>
import jax
import jax.numpy as jnp
from jax.experimental import pallas as pl
from jax.experimental.pallas import tpu as pltpu

_SCALE = 100.0
_THRESH = 0.06
_COEF = 0.02
_LANES = 128
_TILE_R = 1024  # rows per grid step for large inputs: (1024,128) f32 = 512 KiB


def scaled_tanh_kernel(x_ref, o_ref):
    x = x_ref[...]
    y = jnp.tanh(x * jnp.float32(_SCALE))
    # log(exp(x)) simplified to x (see header); fused masked branches:
    #   x >  0.06 -> 0.02 * (x - 0.06)
    #   x <  0.06 -> 0.02 * (x + 0.06)
    #   x == 0.06 -> 0
    t = jnp.float32(_THRESH)
    adj = jnp.where(x > t, x - t, jnp.where(x < t, x + t, jnp.float32(0.0)))
    o_ref[...] = y + jnp.float32(_COEF) * adj


def scaled_tanh(x: jax.Array) -> jax.Array:
    """Apply ScaledTanh elementwise to an arbitrary-shape float array."""
    orig_shape = x.shape
    orig_dtype = x.dtype
    numel = x.size

    xf = x.reshape(-1).astype(jnp.float32)

    # Flatten onto a lane-dense (rows, 128) slab.  Pad so the chosen tiling
    # divides cleanly (8-row quantum for the single-block path, TILE_R for
    # the tiled path); padded tail is sliced off afterwards.
    small = numel <= _TILE_R * _LANES
    pad_quantum = (8 * _LANES) if small else (_TILE_R * _LANES)
    pad = (-numel) % pad_quantum
    if pad:
        xf = jnp.concatenate([xf, jnp.zeros((pad,), jnp.float32)])
    rows = xf.size // _LANES
    x2d = xf.reshape(rows, _LANES)

    if small:
        # Whole problem fits trivially in VMEM: one grid-less call with the
        # full array as a single block.  No pipeline/grid bookkeeping.
        out = pl.pallas_call(
            scaled_tanh_kernel,
            out_shape=jax.ShapeDtypeStruct((rows, _LANES), jnp.float32),
            in_specs=[pl.BlockSpec(memory_space=pltpu.MemorySpace.VMEM)],
            out_specs=pl.BlockSpec(memory_space=pltpu.MemorySpace.VMEM),
            input_output_aliases={0: 0},
        )(x2d)
    else:
        # Mem-bound elementwise sweep: big lane-dense row tiles near the HBM
        # roofline; "parallel" lets v7x shard the axis over both TCs.
        out = pl.pallas_call(
            scaled_tanh_kernel,
            out_shape=jax.ShapeDtypeStruct((rows, _LANES), jnp.float32),
            grid=(rows // _TILE_R,),
            in_specs=[pl.BlockSpec((_TILE_R, _LANES), lambda i: (i, 0))],
            out_specs=pl.BlockSpec((_TILE_R, _LANES), lambda i: (i, 0)),
            input_output_aliases={0: 0},
            compiler_params=pltpu.CompilerParams(
                dimension_semantics=("parallel",)),
        )(x2d)

    out_flat = out.reshape(-1)
    if pad:
        out_flat = out_flat[:numel]
    return out_flat.reshape(orig_shape).astype(orig_dtype)


if __name__ == "__main__":
    key = jax.random.PRNGKey(0)
    # NCHW input, small shape consistent with an image-like forward pass.
    x = jax.random.normal(key, (2, 4, 16, 16), dtype=jnp.float32) * 0.1

    y = jax.block_until_ready(scaled_tanh(x))

    # Reference: the literal PyTorch expression (log(exp(x)) kept verbatim).
    def ref(x):
        y = jnp.tanh(x * 100.0)
        y = y + (x > 0.06).astype(x.dtype) * 0.02 * (jnp.log(jnp.exp(x)) - 0.06)
        y = y + (x < 0.06).astype(x.dtype) * 0.02 * (jnp.log(jnp.exp(x)) + 0.06)
        return y

    y_ref = ref(x)
    assert y.shape == x.shape and y.dtype == x.dtype
    assert jnp.allclose(y, y_ref, atol=1e-6, rtol=1e-6), "mismatch vs reference"

    print("KERNEL_OK")
</pallas_src>

<mosaic_0001>
module attributes {stable_mosaic.version = 11 : i64} {
  func.func @scaled_tanh_kernel(%arg0: memref<16x128xf32, #tpu.memory_space<vmem>>, %arg1: memref<16x128xf32, #tpu.memory_space<vmem>>) attributes {dimension_semantics = [], scalar_prefetch = 0 : i64, scratch_operands = 0 : i64, tpu.core_type = #tpu.core_type<tc>} {
    %c0 = arith.constant 0 : index
    %c0_0 = arith.constant 0 : index
    %0 = vector.load %arg0[%c0, %c0_0] : memref<16x128xf32, #tpu.memory_space<vmem>>, vector<16x128xf32>
    %cst = arith.constant 1.000000e+02 : f32
    %1 = vector.broadcast %cst : f32 to vector<16x128xf32>
    %2 = arith.mulf %0, %1 : vector<16x128xf32>
    %3 = math.tanh %2 : vector<16x128xf32>
    %cst_1 = arith.constant 6.000000e-02 : f32
    %4 = vector.broadcast %cst_1 : f32 to vector<16x128xf32>
    %5 = arith.cmpf ogt, %0, %4 : vector<16x128xf32>
    %cst_2 = arith.constant 6.000000e-02 : f32
    %6 = vector.broadcast %cst_2 : f32 to vector<16x128xf32>
    %7 = arith.subf %0, %6 : vector<16x128xf32>
    %cst_3 = arith.constant 6.000000e-02 : f32
    %8 = vector.broadcast %cst_3 : f32 to vector<16x128xf32>
    %9 = arith.cmpf olt, %0, %8 : vector<16x128xf32>
    %cst_4 = arith.constant 6.000000e-02 : f32
    %10 = vector.broadcast %cst_4 : f32 to vector<16x128xf32>
    %11 = arith.addf %0, %10 : vector<16x128xf32>
    %cst_5 = arith.constant 0.000000e+00 : f32
    %12 = vector.broadcast %cst_5 : f32 to vector<16x128xf32>
    %13 = arith.select %9, %11, %12 : vector<16x128xi1>, vector<16x128xf32>
    %14 = arith.select %5, %7, %13 : vector<16x128xi1>, vector<16x128xf32>
    %cst_6 = arith.constant 2.000000e-02 : f32
    %15 = vector.broadcast %cst_6 : f32 to vector<16x128xf32>
    %16 = arith.mulf %15, %14 : vector<16x128xf32>
    %17 = arith.addf %3, %16 : vector<16x128xf32>
    %c0_7 = arith.constant 0 : index
    %c0_8 = arith.constant 0 : index
    %18 = vector.load %arg1[%c0_7, %c0_8] : memref<16x128xf32, #tpu.memory_space<vmem>>, vector<16x128xf32>
    tpu.vector_store %arg1[%c0_7, %c0_8], %17 {strides = array<i32>} : memref<16x128xf32, #tpu.memory_space<vmem>>, vector<16x128xf32>,
    return
  }
}

</mosaic_0001>

<bundles_post_ra>
// kernel: tpu_custom_call.1
= control target key start
LH: loop header
LB: loop body
LE: loop exit
PB: predicated region body
PF: predicated region fallthrough
CT: control target
= control target key end

     0   :  { %6 = vsyncpa [#allocation3], 0  ;;  %s156_s0 = inlined_call_operand.hbm [shape: f32[16,128], index: 0, kind: input, shape index: {}, may-alias: {0,1}]   ;;  %s157_s1 = inlined_call_operand.hbm [shape: f32[16,128], index: 1, kind: output, shape index: {}, may-alias: {0,1}]  }
   0x1   :  { %7 = vsyncpa [#allocation4], 0  ;;  %s12_s8 = sshll.u32 %s156_s0, 4  ;;  %s130_s9 = smov [#allocation2]   ;;  %s13_s8 = int_to_ptr.hbm [resolvable:$true] %s12_s8 }
   0x2   :  { %s14_s10 = sshll.u32 %s130_s9, 4  ;;  %s131_s11 = smov 128   ;;  %s15_s10 = int_to_ptr.vmem [resolvable:$true] %s14_s10 }
   0x3   :  { %s132_s12 = smov 8  }
   0x4   :  { %20 = dma.hbm_to_vmem [thread:$0]  %s13_s8, 256, %s15_s10, [#allocation3], %s131_s11, %s131_s11, %s132_s12  }
   0x5   :  { %126 = dma.done.wait [#allocation3], 256  }
   0x6   :  { %127 = vsyncadd [#allocation3], 4294967040  ;;  %v25_v0 = vld [vmem:[#allocation2] sm:$0xff]  ;;  %v26_v1 = vld [vmem:[#allocation2 + $0x8] sm:$0xff]  ;;  %s133_s0 = smov [#allocation5]   ;;  %s55_s16 = sshll.u32 %s157_s1, 4  ;;  %s56_s16 = int_to_ptr.hbm [resolvable:$true] %s55_s16 }
   0x7   :  { %v27_v2 = vmul.f32 100.0, %v25_v0  ;;  %vm31_vm0 = vcmp.gt.f32.partialorder %v25_v0, 0.06  ;;  %v68_v3 = vadd.f32 -0.06, %v25_v0  ;;  %v28_v4 = vmul.f32 100.0, %v26_v1 }
   0x8   :  { %vm35_vm1 = vcmp.lt.f32.partialorder %v25_v0, 0.06  ;;  %v37_v5 = vadd.f32 0.06, %v25_v0  ;;  %vm32_vm2 = vcmp.gt.f32.partialorder %v26_v1, 0.06 }
   0x9   :  { %74 = vtanh.f32 %v27_v2  ;;  %v69_v6 = vadd.f32 -0.06, %v26_v1  ;;  %vm36_vm3 = vcmp.lt.f32.partialorder %v26_v1, 0.06  ;;  %v38_v7 = vadd.f32 0.06, %v26_v1 }
   0xa   :  { %v39_v8 = vsel %vm35_vm1, %v37_v5, 0.0  ;;  %76 = vtanh.f32 %v28_v4  ;;  %s53_s13 = sshll.u32 %s133_s0, 4  ;;  %s54_s13 = int_to_ptr.vmem [resolvable:$true] %s53_s13 }
   0xb   :  { %v41_v9 = vsel %vm31_vm0, %v68_v3, %v39_v8  ;;  %v40_v10 = vsel %vm36_vm3, %v38_v7, 0.0 }
   0xc   :  { %v43_v11 = vmul.f32 0.02, %v41_v9  ;;  %v42_v12 = vsel %vm32_vm2, %v69_v6, %v40_v10 }
   0xd   :  { %v44_v13 = vmul.f32 0.02, %v42_v12 }
   0xf   :  { %v75_v14 = vpop.eup %74 }
  0x10   :  { %v77_v15 = vpop.eup %76  ;;  %v45_v16 = vadd.f32 %v75_v14, %v43_v11 }
  0x11   :  { %v46_v17 = vadd.f32 %v77_v15, %v44_v13 }
  0x12   :  { %47 = vst [vmem:[#allocation5] sm:$0xff] %v45_v16 }
  0x13   :  { %48 = vst [vmem:[#allocation5 + $0x8] sm:$0xff] %v46_v17 }
  0x14   :  { %61 = dma.vmem_to_hbm [thread:$0]  %s54_s13, 256, %s56_s16, [#allocation4], %s131_s11, %s131_s11, %s132_s12  }
  0x15   :  { %128 = dma.done.wait [#allocation4], 256  }
  0x16   :  { %129 = vsyncadd [#allocation4], 4294967040 }
  0x17   :  { %66 = vsyncpa [#allocation3], 1 }
  0x18   :  { %67 = vsyncpa [#allocation4], 1 }

</bundles_post_ra>
